<compile_context>
chip_gen: v7x
topology: tpu7x:2x2x1
jax: 0.10.0
libtpu: 0.0.40
codegen_flags: <defaults>
</compile_context>

<pallas_src>
import jax
import jax.numpy as jnp
from jax.experimental import pallas as pl
from jax.experimental.pallas import tpu as pltpu

EPS = 1e-5


def _round_up(x, m):
    return (x + m - 1) // m * m


def _patch_merge_kernel(x_ref, w_ref, b_ref, o_ref):
    # x_ref: (tm, 4C) merged tokens
    # w_ref: (4C, 2C) gamma-folded reduction weight
    # b_ref: (1, 2C)  beta-folded bias (f32)
    # o_ref: (tm, 2C)
    x = x_ref[...].astype(jnp.float32)

    # LayerNorm statistics over the last (4C) axis, in f32.
    mean = jnp.mean(x, axis=-1, keepdims=True)
    xc = x - mean
    var = jnp.mean(xc * xc, axis=-1, keepdims=True)
    inv = jax.lax.rsqrt(var + EPS)
    xhat = (xc * inv).astype(w_ref.dtype)  # cast only at the MXU input

    acc = jnp.dot(xhat, w_ref[...], preferred_element_type=jnp.float32)
    o_ref[...] = (acc + b_ref[...].astype(jnp.float32)).astype(o_ref.dtype)


def patch_merging(x, H, W, gamma, beta, weight, *, tm=1024,
                  vmem_budget_bytes=24 * 1024 * 1024):
    """Pallas PatchMerging forward.

    x:      (B, H, W, C) or (B, H*W, C)
    gamma:  (4C,) LayerNorm weight
    beta:   (4C,) LayerNorm bias
    weight: (2C, 4C) nn.Linear weight (PyTorch convention: out = x @ weight.T)
    returns (B, (H//2)*(W//2), 2C)
    """
    if x.ndim == 4:
        B, H, W, C = x.shape
    elif x.ndim == 3:
        B, L, C = x.shape
        assert L == H * W, "input feature has wrong size"
        x = x.reshape(B, H, W, C)
    else:
        raise ValueError(f"Input tensor must be 3D or 4D, got {x.ndim}D")
    assert H % 2 == 0 and W % 2 == 0, "H and W must be even"

    c4, c2 = 4 * C, 2 * C

    # Gather 2x2 neighbors, concat on channels (same order as the PyTorch ref).
    # With allow_input_fusion + jit, XLA fuses this into the kernel's input.
    x0 = x[:, 0::2, 0::2, :]
    x1 = x[:, 1::2, 0::2, :]
    x2 = x[:, 0::2, 1::2, :]
    x3 = x[:, 1::2, 1::2, :]
    xm = jnp.concatenate([x0, x1, x2, x3], axis=-1)  # (B, H/2, W/2, 4C)
    rows = B * (H // 2) * (W // 2)
    xm = xm.reshape(rows, c4)

    # Fold the LayerNorm affine into the reduction weight / bias.
    w_f32 = weight.astype(jnp.float32)
    w_prime = (gamma.astype(jnp.float32)[:, None] * w_f32.T).astype(weight.dtype)
    b_prime = beta.astype(jnp.float32)[None, :] @ w_f32.T          # (1, 2C) f32

    in_sz = jnp.dtype(x.dtype).itemsize
    w_sz = jnp.dtype(weight.dtype).itemsize

    # Pick the biggest row tile that fits a per-generation-safe VMEM budget
    # (v7x only has 64 MiB physical; keep the working set well under that).
    tm = max(8, min(int(tm), _round_up(rows, 8)))
    tm = _round_up(tm, 8)
    w_resident = 2 * c4 * c2 * w_sz + 2 * c2 * 4        # double-buffered weight + bias

    def _act_bytes(t):
        return 2 * t * c4 * in_sz + 2 * t * c2 * in_sz  # double-buffered in + out

    while tm > 8 and _act_bytes(tm) + w_resident > vmem_budget_bytes:
        tm = _round_up(max(8, tm // 2), 8)

    rows_p = _round_up(rows, tm)
    if rows_p != rows:
        xm = jnp.pad(xm, ((0, rows_p - rows), (0, 0)))

    vmem_limit = int(min(56 * 1024 * 1024,
                         max(32 * 1024 * 1024,
                             2 * (_act_bytes(tm) + w_resident))))

    out = pl.pallas_call(
        _patch_merge_kernel,
        out_shape=jax.ShapeDtypeStruct((rows_p, c2), x.dtype),
        grid_spec=pltpu.PrefetchScalarGridSpec(
            num_scalar_prefetch=0,
            grid=(rows_p // tm,),
            in_specs=[
                pl.BlockSpec((tm, c4), lambda i: (i, 0)),
                pl.BlockSpec((c4, c2), lambda i: (0, 0)),
                pl.BlockSpec((1, c2), lambda i: (0, 0)),
            ],
            out_specs=pl.BlockSpec((tm, c2), lambda i: (i, 0)),
        ),
        compiler_params=pltpu.CompilerParams(
            dimension_semantics=("parallel",),
            vmem_limit_bytes=vmem_limit,
            allow_input_fusion=[True, False, False],
        ),
    )(xm, w_prime, b_prime)

    if rows_p != rows:
        out = out[:rows]
    return out.reshape(B, (H // 2) * (W // 2), c2)


def _reference(x, gamma, beta, weight):
    B, H, W, C = x.shape
    x0 = x[:, 0::2, 0::2, :]
    x1 = x[:, 1::2, 0::2, :]
    x2 = x[:, 0::2, 1::2, :]
    x3 = x[:, 1::2, 1::2, :]
    xm = jnp.concatenate([x0, x1, x2, x3], axis=-1).reshape(B, -1, 4 * C)
    mean = jnp.mean(xm, axis=-1, keepdims=True)
    var = jnp.mean((xm - mean) ** 2, axis=-1, keepdims=True)
    xn = (xm - mean) / jnp.sqrt(var + EPS) * gamma + beta
    return xn @ weight.T


if __name__ == "__main__":
    key = jax.random.PRNGKey(0)
    k_x, k_w, k_g, k_b, k_x2 = jax.random.split(key, 5)

    # Case 1: dim=64 -> LayerNorm(256), Linear(256 -> 128); lane-dense 2C=128 output.
    B, H, W, C = 2, 16, 16, 64
    x = jax.random.normal(k_x, (B, H, W, C), dtype=jnp.float32)

    # Deterministic parameter init (synthetic, not a checkpoint).
    weight = jax.random.normal(k_w, (2 * C, 4 * C), dtype=jnp.float32) * 0.02
    gamma = jnp.ones((4 * C,), dtype=jnp.float32) + 0.1 * jax.random.normal(
        k_g, (4 * C,), dtype=jnp.float32
    )
    beta = 0.1 * jax.random.normal(k_b, (4 * C,), dtype=jnp.float32)

    merge = jax.jit(patch_merging, static_argnums=(1, 2))

    out = jax.block_until_ready(merge(x, H, W, gamma, beta, weight))
    ref = _reference(x, gamma, beta, weight)
    assert out.shape == (B, (H // 2) * (W // 2), 2 * C), out.shape
    assert jnp.allclose(out, ref, atol=5e-4, rtol=5e-4), (
        float(jnp.max(jnp.abs(out - ref)))
    )

    # Case 2: rows = 2*7*7 = 98 (not a tile multiple) exercises the padded grid path.
    H2 = W2 = 14
    x2 = jax.random.normal(k_x2, (B, H2, W2, C), dtype=jnp.float32)
    out2 = jax.block_until_ready(merge(x2, H2, W2, gamma, beta, weight))
    ref2 = _reference(x2, gamma, beta, weight)
    assert out2.shape == (B, (H2 // 2) * (W2 // 2), 2 * C), out2.shape
    assert jnp.allclose(out2, ref2, atol=5e-4, rtol=5e-4), (
        float(jnp.max(jnp.abs(out2 - ref2)))
    )

    print("KERNEL_OK")
</pallas_src>

<mosaic_0001>
module attributes {stable_mosaic.version = 11 : i64} {
  func.func @_patch_merge_kernel(%arg0: i32, %arg1: memref<128x256xf32, #tpu.memory_space<vmem>>, %arg2: memref<256x128xf32, #tpu.memory_space<vmem>>, %arg3: memref<1x128xf32, #tpu.memory_space<vmem>>, %arg4: memref<128x128xf32, #tpu.memory_space<vmem>>) attributes {dimension_semantics = [#tpu.dimension_semantics<parallel>], iteration_bounds = array<i64: 1>, scalar_prefetch = 0 : i64, scratch_operands = 0 : i64, tpu.core_type = #tpu.core_type<tc>, window_params = [{transform_indices = @transform_0, window_bounds = array<i64: 128, 256>}, {pipeline_mode = #tpu.pipeline_mode<synchronous>, transform_indices = @transform_1, window_bounds = array<i64: 256, 128>}, {pipeline_mode = #tpu.pipeline_mode<synchronous>, transform_indices = @transform_2, window_bounds = array<i64: 1, 128>}, {transform_indices = @transform_3, window_bounds = array<i64: 128, 128>}]} {
    %c0 = arith.constant 0 : index
    %c0_0 = arith.constant 0 : index
    %0 = vector.load %arg1[%c0, %c0_0] : memref<128x256xf32, #tpu.memory_space<vmem>>, vector<128x256xf32>
    %cst = arith.constant dense<0.000000e+00> : vector<128xf32>
    %1 = vector.multi_reduction <add>, %0, %cst [1] : vector<128x256xf32> to vector<128xf32>
    %2 = vector.shape_cast %1 : vector<128xf32> to vector<128x1xf32>
    %cst_1 = arith.constant 2.560000e+02 : f32
    %3 = vector.broadcast %cst_1 : f32 to vector<128x1xf32>
    %4 = arith.divf %2, %3 : vector<128x1xf32>
    %5 = vector.broadcast %4 : vector<128x1xf32> to vector<128x256xf32>
    %6 = arith.subf %0, %5 : vector<128x256xf32>
    %7 = arith.mulf %6, %6 : vector<128x256xf32>
    %cst_2 = arith.constant dense<0.000000e+00> : vector<128xf32>
    %8 = vector.multi_reduction <add>, %7, %cst_2 [1] : vector<128x256xf32> to vector<128xf32>
    %9 = vector.shape_cast %8 : vector<128xf32> to vector<128x1xf32>
    %cst_3 = arith.constant 2.560000e+02 : f32
    %10 = vector.broadcast %cst_3 : f32 to vector<128x1xf32>
    %11 = arith.divf %9, %10 : vector<128x1xf32>
    %cst_4 = arith.constant 9.99999974E-6 : f32
    %12 = vector.broadcast %cst_4 : f32 to vector<128x1xf32>
    %13 = arith.addf %11, %12 : vector<128x1xf32>
    %14 = math.rsqrt %13 : vector<128x1xf32>
    %15 = vector.broadcast %14 : vector<128x1xf32> to vector<128x256xf32>
    %16 = arith.mulf %6, %15 : vector<128x256xf32>
    %c0_5 = arith.constant 0 : index
    %c0_6 = arith.constant 0 : index
    %17 = vector.load %arg2[%c0_5, %c0_6] : memref<256x128xf32, #tpu.memory_space<vmem>>, vector<256x128xf32>
    %cst_7 = arith.constant dense<0.000000e+00> : vector<128x128xf32>
    %18 = tpu.matmul %16, %17, %cst_7 {dimension_numbers = #tpu.dot_dimension_numbers<[1], [0], [0], [1], [0, 0, 1, 1], [], []>} : vector<128x256xf32>, vector<256x128xf32>, vector<128x128xf32> -> vector<128x128xf32>
    %c0_8 = arith.constant 0 : index
    %c0_9 = arith.constant 0 : index
    %19 = vector.load %arg3[%c0_8, %c0_9] : memref<1x128xf32, #tpu.memory_space<vmem>>, vector<1x128xf32>
    %20 = vector.broadcast %19 : vector<1x128xf32> to vector<128x128xf32>
    %21 = arith.addf %18, %20 : vector<128x128xf32>
    %c0_10 = arith.constant 0 : index
    %c0_11 = arith.constant 0 : index
    %22 = vector.load %arg4[%c0_10, %c0_11] : memref<128x128xf32, #tpu.memory_space<vmem>>, vector<128x128xf32>
    tpu.vector_store %arg4[%c0_10, %c0_11], %21 {strides = array<i32>} : memref<128x128xf32, #tpu.memory_space<vmem>>, vector<128x128xf32>,
    return
  }
  func.func @transform_0(%arg0: i32) -> (i32, i32) {
    %c0_i32 = arith.constant 0 : i32
    %c0_i32_0 = arith.constant 0 : i32
    return %arg0, %c0_i32 : i32, i32
  }
  func.func @transform_1(%arg0: i32) -> (i32, i32) {
    %c0_i32 = arith.constant 0 : i32
    %c0_i32_0 = arith.constant 0 : i32
    %c0_i32_1 = arith.constant 0 : i32
    return %c0_i32, %c0_i32_0 : i32, i32
  }
  func.func @transform_2(%arg0: i32) -> (i32, i32) {
    %c0_i32 = arith.constant 0 : i32
    %c0_i32_0 = arith.constant 0 : i32
    %c0_i32_1 = arith.constant 0 : i32
    return %c0_i32, %c0_i32_0 : i32, i32
  }
  func.func @transform_3(%arg0: i32) -> (i32, i32) {
    %c0_i32 = arith.constant 0 : i32
    %c0_i32_0 = arith.constant 0 : i32
    return %arg0, %c0_i32 : i32, i32
  }
}

</mosaic_0001>

<bundles_post_ra>
// kernel: patch_merging.1
= control target key start
LH: loop header
LB: loop body
LE: loop exit
PB: predicated region body
PF: predicated region fallthrough
CT: control target
= control target key end

     0   :  { %s1244_s0 = inlined_call_operand.vmem [shape: f32[128,256], index: 0, kind: input, shape index: {}]   ;;  %s1245_s1 = inlined_call_operand.vmem [shape: f32[256,128], index: 1, kind: input, shape index: {}]   ;;  %s1246_s2 = inlined_call_operand.vmem [shape: f32[1,128], index: 2, kind: input, shape index: {}]   ;;  %s1247_s3 = inlined_call_operand.hbm [shape: f32[128,128], index: 3, kind: output, shape index: {}]  }
   0x1   :  { %v734_v0 = vld [vmem:[%s1244_s0] sm:$0xff]  ;;  %v739_v1 = vld [vmem:[%s1244_s0 + $0x8] sm:$0xff]  ;;  %v744_v2 = vld [vmem:[%s1244_s0 + $0x10] sm:$0xff] }
   0x2   :  { %v47_v3 = vadd.f32 %v739_v1, %v734_v0  ;;  %v751_v4 = vld [vmem:[%s1244_s0 + $0x18] sm:$0xff]  ;;  %v756_v5 = vld [vmem:[%s1244_s0 + $0x80] sm:$0xff]  ;;  %v761_v6 = vld [vmem:[%s1244_s0 + $0x88] sm:$0xff] }
   0x3   :  { %v50_v7 = vadd.f32 %v751_v4, %v744_v2  ;;  %v768_v8 = vld [vmem:[%s1244_s0 + $0x90] sm:$0xff]  ;;  %v773_v9 = vld [vmem:[%s1244_s0 + $0x98] sm:$0xff]  ;;  %v71_v10 = vadd.f32 %v761_v6, %v756_v5  ;;  %v782_v12 = vld [vmem:[%s1244_s0 + $0x20] sm:$0xff] }
   0x4   :  { %48 = vadd.xlane.f32.xlu0 %v47_v3  ;;  %v74_v11 = vadd.f32 %v773_v9, %v768_v8  ;;  %v787_v13 = vld [vmem:[%s1244_s0 + $0x28] sm:$0xff]  ;;  %v792_v14 = vld [vmem:[%s1244_s0 + $0xa0] sm:$0xff]  ;;  %v806_v18 = vld [vmem:[%s1244_s0 + $0x30] sm:$0xff] }
   0x5   :  { %51 = vadd.xlane.f32.xlu1 %v50_v7  ;;  %v797_v15 = vld [vmem:[%s1244_s0 + $0xa8] sm:$0xff]  ;;  %v53_v16 = vadd.f32 %v787_v13, %v782_v12  ;;  %v811_v19 = vld [vmem:[%s1244_s0 + $0x38] sm:$0xff]  ;;  %v816_v20 = vld [vmem:[%s1244_s0 + $0xb0] sm:$0xff] }
   0x6   :  { %v77_v17 = vadd.f32 %v797_v15, %v792_v14  ;;  %v821_v21 = vld [vmem:[%s1244_s0 + $0xb8] sm:$0xff] }
   0x8   :  { %72 = vadd.xlane.f32.xlu0 %v71_v10 }
   0x9   :  { %75 = vadd.xlane.f32.xlu1 %v74_v11 }
   0xa   :  { %8 = vsyncpa [#allocation3], 0  ;;  %v56_v22 = vadd.f32 %v811_v19, %v806_v18  ;;  %v80_v23 = vadd.f32 %v821_v21, %v816_v20  ;;  %v830_v24 = vld [vmem:[%s1244_s0 + $0x40] sm:$0xff]  ;;  %v835_v25 = vld [vmem:[%s1244_s0 + $0x48] sm:$0xff] }
   0xb   :  { %v840_v26 = vld [vmem:[%s1244_s0 + $0xc0] sm:$0xff]  ;;  %v845_v27 = vld [vmem:[%s1244_s0 + $0xc8] sm:$0xff]  ;;  %v59_v28 = vadd.f32 %v835_v25, %v830_v24  ;;  %v854_v30 = vld [vmem:[%s1244_s0 + $0x50] sm:$0xff] }
   0xc   :  { %54 = vadd.xlane.f32.xlu0 %v53_v16  ;;  %v83_v29 = vadd.f32 %v845_v27, %v840_v26  ;;  %v859_v31 = vld [vmem:[%s1244_s0 + $0x58] sm:$0xff]  ;;  %v864_v32 = vld [vmem:[%s1244_s0 + $0xd0] sm:$0xff]  ;;  %v878_v36 = vld [vmem:[%s1244_s0 + $0x60] sm:$0xff] }
   0xd   :  { %78 = vadd.xlane.f32.xlu1 %v77_v17  ;;  %v869_v33 = vld [vmem:[%s1244_s0 + $0xd8] sm:$0xff]  ;;  %v62_v34 = vadd.f32 %v859_v31, %v854_v30  ;;  %v883_v37 = vld [vmem:[%s1244_s0 + $0x68] sm:$0xff]  ;;  %v888_v38 = vld [vmem:[%s1244_s0 + $0xe0] sm:$0xff] }
   0xe   :  { %v86_v35 = vadd.f32 %v869_v33, %v864_v32  ;;  %v893_v39 = vld [vmem:[%s1244_s0 + $0xe8] sm:$0xff]  ;;  %v65_v40 = vadd.f32 %v883_v37, %v878_v36  ;;  %v902_v42 = vld [vmem:[%s1244_s0 + $0x70] sm:$0xff]  ;;  %v907_v43 = vld [vmem:[%s1244_s0 + $0x78] sm:$0xff] }
   0xf   :  { %v89_v41 = vadd.f32 %v893_v39, %v888_v38  ;;  %v912_v44 = vld [vmem:[%s1244_s0 + $0xf0] sm:$0xff]  ;;  %v917_v45 = vld [vmem:[%s1244_s0 + $0xf8] sm:$0xff]  ;;  %v68_v46 = vadd.f32 %v907_v43, %v902_v42  ;;  %v320_v48 = vld [vmem:[%s1245_s1 + $0x80] sm:$0xff] }
  0x10   :  { %57 = vadd.xlane.f32.xlu0 %v56_v22  ;;  %v92_v47 = vadd.f32 %v917_v45, %v912_v44  ;;  %v321_v49 = vld [vmem:[%s1245_s1 + $0x88] sm:$0xff]  ;;  %v304_v50 = vld [vmem:[%s1245_s1] sm:$0xff]  ;;  %v322_v53 = vld [vmem:[%s1245_s1 + $0x90] sm:$0xff] }
  0x11   :  { %81 = vadd.xlane.f32.xlu1 %v80_v23  ;;  %v601_v51 = vpack.c.bf16 %v321_v49, %v320_v48  ;;  %v305_v52 = vld [vmem:[%s1245_s1 + $0x8] sm:$0xff]  ;;  %v323_v54 = vld [vmem:[%s1245_s1 + $0x98] sm:$0xff]  ;;  %v306_v57 = vld [vmem:[%s1245_s1 + $0x10] sm:$0xff] }
  0x12   :  { %v603_v55 = vpack.c.bf16 %v305_v52, %v304_v50  ;;  %v605_v56 = vpack.c.bf16 %v323_v54, %v322_v53  ;;  %v307_v58 = vld [vmem:[%s1245_s1 + $0x18] sm:$0xff]  ;;  %v324_v59 = vld [vmem:[%s1245_s1 + $0xa0] sm:$0xff]  ;;  %v325_v60 = vld [vmem:[%s1245_s1 + $0xa8] sm:$0xff] }
  0x13   :  { %602 = vmatprep.subr.bf16.mxu0 %v601_v51  ;;  %633 = vmatprep.subr.bf16.mxu1 %v601_v51  ;;  %v607_v61 = vpack.c.bf16 %v307_v58, %v306_v57  ;;  %v609_v62 = vpack.c.bf16 %v325_v60, %v324_v59  ;;  %v308_v63 = vld [vmem:[%s1245_s1 + $0x20] sm:$0xff]  ;;  %v309_v3 = vld [vmem:[%s1245_s1 + $0x28] sm:$0xff]  ;;  %v326_v7 = vld [vmem:[%s1245_s1 + $0xb0] sm:$0xff] }
  0x14   :  { %60 = vadd.xlane.f32.xlu0 %v59_v28  ;;  %604 = vmatpush3.bf16.msra.mxu0 %v603_v55  ;;  %v327_v10 = vld [vmem:[%s1245_s1 + $0xb8] sm:$0xff]  ;;  %v611_v11 = vpack.c.bf16 %v309_v3, %v308_v63  ;;  %v310_v17 = vld [vmem:[%s1245_s1 + $0x30] sm:$0xff] }
  0x15   :  { %84 = vadd.xlane.f32.xlu1 %v83_v29  ;;  %641 = vmatpush3.bf16.msra.mxu1 %v603_v55  ;;  %v613_v16 = vpack.c.bf16 %v327_v10, %v326_v7  ;;  %v311_v22 = vld [vmem:[%s1245_s1 + $0x38] sm:$0xff] }
  0x16   :  { %606 = vmatprep.subr.bf16.mxu0 %v605_v56  ;;  %634 = vmatprep.subr.bf16.mxu1 %v605_v56  ;;  %v615_v23 = vpack.c.bf16 %v311_v22, %v310_v17 }
  0x18   :  { %63 = vadd.xlane.f32.xlu0 %v62_v34  ;;  %608 = vmatpush3.bf16.msra.mxu0 %v607_v61 }
  0x19   :  { %87 = vadd.xlane.f32.xlu1 %v86_v35  ;;  %642 = vmatpush3.bf16.msra.mxu1 %v607_v61 }
  0x1a   :  { %610 = vmatprep.subr.bf16.mxu0 %v609_v62  ;;  %635 = vmatprep.subr.bf16.mxu1 %v609_v62 }
  0x1c   :  { %66 = vadd.xlane.f32.xlu0 %v65_v40  ;;  %612 = vmatpush3.bf16.msra.mxu0 %v611_v11 }
  0x1d   :  { %90 = vadd.xlane.f32.xlu1 %v89_v41  ;;  %643 = vmatpush3.bf16.msra.mxu1 %v611_v11 }
  0x1e   :  { %614 = vmatprep.subr.bf16.mxu0 %v613_v16  ;;  %636 = vmatprep.subr.bf16.mxu1 %v613_v16 }
  0x20   :  { %69 = vadd.xlane.f32.xlu0 %v68_v46  ;;  %616 = vmatpush3.bf16.msra.mxu0 %v615_v23 }
  0x21   :  { %93 = vadd.xlane.f32.xlu1 %v92_v47  ;;  %644 = vmatpush3.bf16.msra.mxu1 %v615_v23 }
  0x91   :  { %v49_v28 = vpop.xlane.xlu0 %48 }
  0x92   :  { %v96_v29 = vmul.f32 0.00390625, %v49_v28  ;;  %v52_v34 = vpop.xlane.xlu1 %51 }
  0x93   :  { %v97_v35 = vmul.f32 0.00390625, %v52_v34 }
  0x94   :  { %v972_v40 = vsub.f32 %v734_v0, %v96_v29  ;;  %v975_v41 = vsub.f32 %v739_v1, %v96_v29 }
  0x95   :  { %v978_v46 = vsub.f32 %v744_v2, %v97_v35  ;;  %v981_v47 = vsub.f32 %v751_v4, %v97_v35  ;;  %v73_v48 = vpop.xlane.xlu0 %72 }
  0x96   :  { %v104_v49 = vmul.f32 0.00390625, %v73_v48  ;;  %v76_v50 = vpop.xlane.xlu1 %75  ;;  %v144_v51 = vmul.f32 %v972_v40, %v972_v40  ;;  %v145_v52 = vmul.f32 %v975_v41, %v975_v41 }
  0x97   :  { %v105_v0 = vmul.f32 0.00390625, %v76_v50  ;;  %v146_v1 = vmul.f32 %v978_v46, %v978_v46  ;;  %v147_v2 = vmul.f32 %v981_v47, %v981_v47 }
  0x98   :  { %v992_v53 = vsub.f32 %v756_v5, %v104_v49  ;;  %v995_v4 = vsub.f32 %v761_v6, %v104_v49  ;;  %v176_v54 = vadd.f32 %v145_v52, %v144_v51 }
  0x99   :  { %v998_v55 = vsub.f32 %v768_v8, %v105_v0  ;;  %v1001_v56 = vsub.f32 %v773_v9, %v105_v0  ;;  %v55_v57 = vpop.xlane.xlu0 %54  ;;  %v179_v60 = vadd.f32 %v147_v2, %v146_v1 }
  0x9a   :  { %v98_v58 = vmul.f32 0.00390625, %v55_v57  ;;  %177 = vadd.xlane.f32.xlu0 %v176_v54  ;;  %v79_v59 = vpop.xlane.xlu1 %78  ;;  %v160_v61 = vmul.f32 %v992_v53, %v992_v53  ;;  %v161_v5 = vmul.f32 %v995_v4, %v995_v4 }
  0x9b   :  { %v106_v6 = vmul.f32 0.00390625, %v79_v59  ;;  %v162_v62 = vmul.f32 %v998_v55, %v998_v55  ;;  %v163_v8 = vmul.f32 %v1001_v56, %v1001_v56 }
  0x9c   :  { %v1012_v9 = vsub.f32 %v782_v12, %v98_v58  ;;  %v1015_v63 = vsub.f32 %v787_v13, %v98_v58  ;;  %v200_v3 = vadd.f32 %v161_v5, %v160_v61 }
  0x9d   :  { %v1018_v7 = vsub.f32 %v792_v14, %v106_v6  ;;  %v1021_v10 = vsub.f32 %v797_v15, %v106_v6  ;;  %v58_v11 = vpop.xlane.xlu0 %57  ;;  %v203_v22 = vadd.f32 %v163_v8, %v162_v62  ;;  %v328_v62 = vld [vmem:[%s1245_s1 + $0xc0] sm:$0xff]  ;;  %v329_v8 = vld [vmem:[%s1245_s1 + $0xc8] sm:$0xff] }
  0x9e   :  { %v99_v16 = vmul.f32 0.00390625, %v58_v11  ;;  %180 = vadd.xlane.f32.xlu0 %v179_v60  ;;  %201 = vadd.xlane.f32.xlu1 %v200_v3  ;;  %v82_v17 = vpop.xlane.xlu1 %81  ;;  %v148_v12 = vmul.f32 %v1012_v9, %v1012_v9  ;;  %v149_v13 = vmul.f32 %v1015_v63, %v1015_v63 }
  0x9f   :  { %v107_v23 = vmul.f32 0.00390625, %v82_v17  ;;  %v164_v14 = vmul.f32 %v1018_v7, %v1018_v7  ;;  %v165_v15 = vmul.f32 %v1021_v10, %v1021_v10  ;;  %v617_v17 = vpack.c.bf16 %v329_v8, %v328_v62 }
  0xa0   :  { %v1032_v28 = vsub.f32 %v806_v18, %v99_v16  ;;  %v1035_v29 = vsub.f32 %v811_v19, %v99_v16  ;;  %v182_v34 = vadd.f32 %v149_v13, %v148_v12  ;;  %v313_v12 = vld [vmem:[%s1245_s1 + $0x48] sm:$0xff] }
  0xa1   :  { %v1038_v35 = vsub.f32 %v816_v20, %v107_v23  ;;  %v1041_v48 = vsub.f32 %v821_v21, %v107_v23  ;;  %v61_v49 = vpop.xlane.xlu0 %60  ;;  %v206_v52 = vadd.f32 %v165_v15, %v164_v14  ;;  %618 = vmatprep.subr.bf16.mxu0 %v617_v17  ;;  %637 = vmatprep.subr.bf16.mxu1 %v617_v17  ;;  %v332_v17 = vld [vmem:[%s1245_s1 + $0xe0] sm:$0xff] }
  0xa2   :  { %v100_v50 = vmul.f32 0.00390625, %v61_v49  ;;  %204 = vadd.xlane.f32.xlu1 %v203_v22  ;;  %183 = vadd.xlane.f32.xlu0 %v182_v34  ;;  %v85_v51 = vpop.xlane.xlu1 %84  ;;  %v150_v18 = vmul.f32 %v1032_v28, %v1032_v28  ;;  %v151_v19 = vmul.f32 %v1035_v29, %v1035_v29  ;;  %v312_v22 = vld [vmem:[%s1245_s1 + $0x40] sm:$0xff] }
  0xa3   :  { %v108_v0 = vmul.f32 0.00390625, %v85_v51  ;;  %v166_v20 = vmul.f32 %v1038_v35, %v1038_v35  ;;  %v167_v21 = vmul.f32 %v1041_v48, %v1041_v48  ;;  %v619_v14 = vpack.c.bf16 %v313_v12, %v312_v22  ;;  %v333_v22 = vld [vmem:[%s1245_s1 + $0xe8] sm:$0xff] }
  0xa4   :  { %v1052_v1 = vsub.f32 %v830_v24, %v100_v50  ;;  %v1055_v2 = vsub.f32 %v835_v25, %v100_v50  ;;  %v185_v54 = vadd.f32 %v151_v19, %v150_v18 }
  0xa5   :  { %v1058_v57 = vsub.f32 %v840_v26, %v108_v0  ;;  %v1061_v58 = vsub.f32 %v845_v27, %v108_v0  ;;  %v64_v59 = vpop.xlane.xlu0 %63  ;;  %v209_v5 = vadd.f32 %v167_v21, %v166_v20  ;;  %620 = vmatpush3.bf16.msra.mxu0 %v619_v14  ;;  %v330_v0 = vld [vmem:[%s1245_s1 + $0xd0] sm:$0xff]  ;;  %v331_v20 = vld [vmem:[%s1245_s1 + $0xd8] sm:$0xff]  ;;  %645 = vmatpush3.bf16.msra.mxu1 %v619_v14  ;;  %v316_v14 = vld [vmem:[%s1245_s1 + $0x60] sm:$0xff] }
  0xa6   :  { %v101_v60 = vmul.f32 0.00390625, %v64_v59  ;;  %207 = vadd.xlane.f32.xlu1 %v206_v52  ;;  %186 = vadd.xlane.f32.xlu0 %v185_v54  ;;  %v88_v61 = vpop.xlane.xlu1 %87  ;;  %v152_v24 = vmul.f32 %v1052_v1, %v1052_v1  ;;  %v153_v25 = vmul.f32 %v1055_v2, %v1055_v2  ;;  %v621_v59 = vpack.c.bf16 %v331_v20, %v330_v0  ;;  %v319_v0 = vld [vmem:[%s1245_s1 + $0x78] sm:$0xff] }
  0xa7   :  { %v109_v6 = vmul.f32 0.00390625, %v88_v61  ;;  %v168_v26 = vmul.f32 %v1058_v57, %v1058_v57  ;;  %v169_v27 = vmul.f32 %v1061_v58, %v1061_v58  ;;  %v315_v61 = vld [vmem:[%s1245_s1 + $0x58] sm:$0xff] }
  0xa8   :  { %v1078_v3 = vsub.f32 %v854_v30, %v101_v60  ;;  %v1081_v11 = vsub.f32 %v859_v31, %v101_v60  ;;  %v188_v16 = vadd.f32 %v153_v25, %v152_v24  ;;  %v314_v60 = vld [vmem:[%s1245_s1 + $0x50] sm:$0xff]  ;;  %622 = vmatprep.subr.bf16.mxu0 %v621_v59  ;;  %638 = vmatprep.subr.bf16.mxu1 %v621_v59 }
  0xa9   :  { %v1090_v13 = vsub.f32 %v864_v32, %v109_v6  ;;  %v1093_v23 = vsub.f32 %v869_v33, %v109_v6  ;;  %v67_v30 = vpop.xlane.xlu0 %66  ;;  %v212_v34 = vadd.f32 %v169_v27, %v168_v26  ;;  %v623_v25 = vpack.c.bf16 %v315_v61, %v314_v60 }
  0xaa   :  { %v102_v31 = vmul.f32 0.00390625, %v67_v30  ;;  %210 = vadd.xlane.f32.xlu1 %v209_v5  ;;  %189 = vadd.xlane.f32.xlu0 %v188_v16  ;;  %v91_v15 = vpop.xlane.xlu1 %90  ;;  %v154_v49 = vmul.f32 %v1078_v3, %v1078_v3  ;;  %v155_v50 = vmul.f32 %v1081_v11, %v1081_v11 }
  0xab   :  { %v110_v51 = vmul.f32 0.00390625, %v91_v15  ;;  %v170_v32 = vmul.f32 %v1090_v13, %v1090_v13  ;;  %v171_v33 = vmul.f32 %v1093_v23, %v1093_v23  ;;  %624 = vmatpush3.bf16.msra.mxu0 %v623_v25  ;;  %646 = vmatpush3.bf16.msra.mxu1 %v623_v25 }
  0xac   :  { %v1104_v52 = vsub.f32 %v878_v36, %v102_v31  ;;  %v1107_v18 = vsub.f32 %v883_v37, %v102_v31  ;;  %v191_v19 = vadd.f32 %v155_v50, %v154_v49  ;;  %v317_v31 = vld [vmem:[%s1245_s1 + $0x68] sm:$0xff] }
  0xad   :  { %v1116_v21 = vsub.f32 %v888_v38, %v110_v51  ;;  %v1119_v36 = vsub.f32 %v893_v39, %v110_v51  ;;  %v70_v54 = vpop.xlane.xlu0 %69  ;;  %v215_v37 = vadd.f32 %v171_v33, %v170_v32  ;;  %v334_v51 = vld [vmem:[%s1245_s1 + $0xf0] sm:$0xff]  ;;  %v335_v32 = vld [vmem:[%s1245_s1 + $0xf8] sm:$0xff] }
  0xae   :  { %v103_v5 = vmul.f32 0.00390625, %v70_v54  ;;  %213 = vadd.xlane.f32.xlu1 %v212_v34  ;;  %192 = vadd.xlane.f32.xlu0 %v191_v19  ;;  %v94_v24 = vpop.xlane.xlu1 %93  ;;  %v156_v38 = vmul.f32 %v1104_v52, %v1104_v52  ;;  %v157_v39 = vmul.f32 %v1107_v18, %v1107_v18  ;;  %v629_v33 = vpack.c.bf16 %v335_v32, %v334_v51  ;;  %v318_v19 = vld [vmem:[%s1245_s1 + $0x70] sm:$0xff] }
  0xaf   :  { %v111_v6 = vmul.f32 0.00390625, %v94_v24  ;;  %v172_v26 = vmul.f32 %v1116_v21, %v1116_v21  ;;  %v173_v27 = vmul.f32 %v1119_v36, %v1119_v36  ;;  %v631_v54 = vpack.c.bf16 %v319_v0, %v318_v19 }
  0xb0   :  { %v1136_v62 = vsub.f32 %v902_v42, %v103_v5  ;;  %v1139_v8 = vsub.f32 %v907_v43, %v103_v5  ;;  %v194_v16 = vadd.f32 %v157_v39, %v156_v38  ;;  %v625_v43 = vpack.c.bf16 %v333_v22, %v332_v17 }
  0xb1   :  { %v1148_v12 = vsub.f32 %v912_v44, %v111_v6  ;;  %v1151_v42 = vsub.f32 %v917_v45, %v111_v6  ;;  %v218_v30 = vadd.f32 %v173_v27, %v172_v26  ;;  %v627_v45 = vpack.c.bf16 %v317_v31, %v316_v14 }
  0xb2   :  { %216 = vadd.xlane.f32.xlu1 %v215_v37  ;;  %195 = vadd.xlane.f32.xlu0 %v194_v16  ;;  %v158_v15 = vmul.f32 %v1136_v62, %v1136_v62  ;;  %v159_v44 = vmul.f32 %v1139_v8, %v1139_v8 }
  0xb3   :  { %v174_v34 = vmul.f32 %v1148_v12, %v1148_v12  ;;  %v175_v49 = vmul.f32 %v1151_v42, %v1151_v42  ;;  %626 = vmatprep.subr.bf16.mxu0 %v625_v43  ;;  %639 = vmatprep.subr.bf16.mxu1 %v625_v43 }
  0xb4   :  { %v197_v50 = vadd.f32 %v159_v44, %v158_v15  ;;  %628 = vmatpush3.bf16.msra.mxu0 %v627_v45  ;;  %647 = vmatpush3.bf16.msra.mxu1 %v627_v45 }
  0xb5   :  { %v221_v20 = vadd.f32 %v175_v49, %v174_v34  ;;  %630 = vmatprep.subr.bf16.mxu0 %v629_v33  ;;  %640 = vmatprep.subr.bf16.mxu1 %v629_v33 }
  0xb6   :  { %219 = vadd.xlane.f32.xlu1 %v218_v30  ;;  %198 = vadd.xlane.f32.xlu0 %v197_v50 }
  0xb8   :  { %632 = vmatpush3.bf16.msra.mxu0 %v631_v54  ;;  %648 = vmatpush3.bf16.msra.mxu1 %v631_v54 }
  0xba   :  { %222 = vadd.xlane.f32.xlu1 %v221_v20 }
 0x127   :  { %v178_v37 = vpop.xlane.xlu0 %177 }
 0x128   :  { %v224_v59 = vmul.f32 0.00390625, %v178_v37 }
 0x12a   :  { %v240_v60 = vadd.f32 1e-05, %v224_v59 }
 0x12b   :  { %v202_v61 = vpop.xlane.xlu1 %201  ;;  %v181_v5 = vpop.xlane.xlu0 %180 }
 0x12c   :  { %652 = vrsqrt.f32 %v240_v60  ;;  %v232_v24 = vmul.f32 0.00390625, %v202_v61  ;;  %v225_v38 = vmul.f32 0.00390625, %v181_v5 }
 0x12e   :  { %v248_v39 = vadd.f32 1e-05, %v232_v24  ;;  %v241_v25 = vadd.f32 1e-05, %v225_v38 }
 0x12f   :  { %v205_v6 = vpop.xlane.xlu1 %204  ;;  %v184_v26 = vpop.xlane.xlu0 %183 }
 0x130   :  { %654 = vrsqrt.f32 %v248_v39  ;;  %v233_v27 = vmul.f32 0.00390625, %v205_v6  ;;  %v226_v16 = vmul.f32 0.00390625, %v184_v26 }
 0x131   :  { %656 = vrsqrt.f32 %v241_v25 }
 0x132   :  { %v249_v17 = vadd.f32 1e-05, %v233_v27  ;;  %v242_v22 = vadd.f32 1e-05, %v226_v16 }
 0x133   :  { %v208_v30 = vpop.xlane.xlu1 %207  ;;  %v187_v43 = vpop.xlane.xlu0 %186 }
 0x134   :  { %658 = vrsqrt.f32 %v249_v17  ;;  %v234_v14 = vmul.f32 0.00390625, %v208_v30  ;;  %v227_v31 = vmul.f32 0.00390625, %v187_v43 }
 0x135   :  { %660 = vrsqrt.f32 %v242_v22 }
 0x136   :  { %v653_v15 = vpop.eup %652  ;;  %v250_v44 = vadd.f32 1e-05, %v234_v14  ;;  %v243_v45 = vadd.f32 1e-05, %v227_v31 }
 0x137   :  { %v211_v34 = vpop.xlane.xlu1 %210  ;;  %v190_v49 = vpop.xlane.xlu0 %189  ;;  %v273_v50 = vmul.f32 %v653_v15, %v975_v41  ;;  %v272_v51 = vmul.f32 %v653_v15, %v972_v40 }
 0x138   :  { %662 = vrsqrt.f32 %v250_v44  ;;  %v235_v32 = vmul.f32 0.00390625, %v211_v34  ;;  %v228_v33 = vmul.f32 0.00390625, %v190_v49 }
 0x139   :  { %664 = vrsqrt.f32 %v243_v45  ;;  %407 = vmatprep.mubr.f32.mxu0 %v273_v50 }
 0x13a   :  { %v655_v19 = vpop.eup %654  ;;  %v251_v0 = vadd.f32 1e-05, %v235_v32  ;;  %v244_v20 = vadd.f32 1e-05, %v228_v33  ;;  %408 = vmatmul.mubr.f32.vlgmr.msra.gmra.mrb[0].mxu0 %v272_v51 }
 0x13b   :  { %v657_v54 = vpop.eup %656  ;;  %v214_v37 = vpop.xlane.xlu1 %213  ;;  %v289_v60 = vmul.f32 %v655_v19, %v995_v4  ;;  %v288_v61 = vmul.f32 %v655_v19, %v992_v53 }
 0x13c   :  { %v193_v59 = vpop.xlane.xlu0 %192  ;;  %666 = vrsqrt.f32 %v251_v0  ;;  %v236_v41 = vmul.f32 0.00390625, %v214_v37  ;;  %v275_v40 = vmul.f32 %v657_v54, %v981_v47  ;;  %v274_v24 = vmul.f32 %v657_v54, %v978_v46 }
 0x13d   :  { %v229_v5 = vmul.f32 0.00390625, %v193_v59  ;;  %668 = vrsqrt.f32 %v244_v20  ;;  %447 = vmatprep.mubr.f32.mxu1 %v289_v60 }
 0x13e   :  { %v659_v38 = vpop.eup %658  ;;  %v252_v39 = vadd.f32 1e-05, %v236_v41  ;;  %412 = vmatprep.mubr.f32.mxu0 %v275_v40  ;;  %448 = vmatmul.mubr.f32.vlgmr.msra.gmra.mrb[0].mxu1 %v288_v61 }
 0x13f   :  { %v245_v25 = vadd.f32 1e-05, %v229_v5  ;;  %v661_v6 = vpop.eup %660  ;;  %413 = vmatmul.mubr.f32.gmra.mrb[2].mxu0 %v274_v24  ;;  %v217_v26 = vpop.xlane.xlu1 %216  ;;  %v291_v53 = vmul.f32 %v659_v38, %v1001_v56  ;;  %v290_v27 = vmul.f32 %v659_v38, %v998_v55 }
 0x140   :  { %v196_v4 = vpop.xlane.xlu0 %195  ;;  %670 = vrsqrt.f32 %v252_v39  ;;  %v237_v16 = vmul.f32 0.00390625, %v217_v26  ;;  %v277_v17 = vmul.f32 %v661_v6, %v1015_v63  ;;  %v276_v46 = vmul.f32 %v661_v6, %v1012_v9 }
 0x141   :  { %v230_v47 = vmul.f32 0.00390625, %v196_v4  ;;  %672 = vrsqrt.f32 %v245_v25  ;;  %452 = vmatprep.mubr.f32.mxu1 %v291_v53 }
 0x142   :  { %v663_v22 = vpop.eup %662  ;;  %v253_v30 = vadd.f32 1e-05, %v237_v16  ;;  %417 = vmatprep.mubr.f32.mxu0 %v277_v17  ;;  %453 = vmatmul.mubr.f32.gmra.mrb[2].mxu1 %v290_v27 }
 0x143   :  { %v246_v43 = vadd.f32 1e-05, %v230_v47  ;;  %v665_v14 = vpop.eup %664  ;;  %418 = vmatmul.mubr.f32.gmra.mrb[4].mxu0 %v276_v46  ;;  %v220_v31 = vpop.xlane.xlu1 %219  ;;  %v293_v55 = vmul.f32 %v663_v22, %v1021_v10  ;;  %v292_v15 = vmul.f32 %v663_v22, %v1018_v7 }
 0x144   :  { %v199_v56 = vpop.xlane.xlu0 %198  ;;  %674 = vrsqrt.f32 %v253_v30  ;;  %v238_v44 = vmul.f32 0.00390625, %v220_v31  ;;  %v279_v45 = vmul.f32 %v665_v14, %v1035_v29  ;;  %v278_v9 = vmul.f32 %v665_v14, %v1032_v28 }
 0x145   :  { %v231_v63 = vmul.f32 0.00390625, %v199_v56  ;;  %676 = vrsqrt.f32 %v246_v43  ;;  %457 = vmatprep.mubr.f32.mxu1 %v293_v55 }
 0x146   :  { %v667_v34 = vpop.eup %666  ;;  %v254_v49 = vadd.f32 1e-05, %v238_v44  ;;  %422 = vmatprep.mubr.f32.mxu0 %v279_v45  ;;  %458 = vmatmul.mubr.f32.gmra.mrb[4].mxu1 %v292_v15 }
 0x147   :  { %v247_v50 = vadd.f32 1e-05, %v231_v63  ;;  %v669_v51 = vpop.eup %668  ;;  %423 = vmatmul.mubr.f32.gmra.mrb[6].mxu0 %v278_v9  ;;  %v223_v32 = vpop.xlane.xlu1 %222  ;;  %v295_v10 = vmul.f32 %v667_v34, %v1041_v48  ;;  %v294_v7 = vmul.f32 %v667_v34, %v1038_v35 }
 0x148   :  { %678 = vrsqrt.f32 %v254_v49  ;;  %v239_v33 = vmul.f32 0.00390625, %v223_v32  ;;  %v281_v29 = vmul.f32 %v669_v51, %v1055_v2  ;;  %v280_v19 = vmul.f32 %v669_v51, %v1052_v1 }
 0x149   :  { %680 = vrsqrt.f32 %v247_v50  ;;  %462 = vmatprep.mubr.f32.mxu1 %v295_v10 }
 0x14a   :  { %v671_v28 = vpop.eup %670  ;;  %v255_v0 = vadd.f32 1e-05, %v239_v33  ;;  %427 = vmatprep.mubr.f32.mxu0 %v281_v29  ;;  %463 = vmatmul.mubr.f32.gmra.mrb[6].mxu1 %v294_v7 }
 0x14b   :  { %v673_v20 = vpop.eup %672  ;;  %428 = vmatmul.mubr.f32.gmra.mrb[8].mxu0 %v280_v19  ;;  %v297_v54 = vmul.f32 %v671_v28, %v1061_v58  ;;  %v296_v48 = vmul.f32 %v671_v28, %v1058_v57 }
 0x14c   :  { %682 = vrsqrt.f32 %v255_v0  ;;  %v283_v35 = vmul.f32 %v673_v20, %v1081_v11  ;;  %v282_v37 = vmul.f32 %v673_v20, %v1078_v3 }
 0x14d   :  { %467 = vmatprep.mubr.f32.mxu1 %v297_v54 }
 0x14e   :  { %v675_v2 = vpop.eup %674  ;;  %432 = vmatprep.mubr.f32.mxu0 %v283_v35  ;;  %468 = vmatmul.mubr.f32.gmra.mrb[8].mxu1 %v296_v48 }
 0x14f   :  { %v677_v1 = vpop.eup %676  ;;  %433 = vmatmul.mubr.f32.gmra.mrb[10].mxu0 %v282_v37  ;;  %v299_v59 = vmul.f32 %v675_v2, %v1093_v23  ;;  %v298_v60 = vmul.f32 %v675_v2, %v1090_v13 }
 0x150   :  { %v285_v61 = vmul.f32 %v677_v1, %v1107_v18  ;;  %v284_v58 = vmul.f32 %v677_v1, %v1104_v52 }
 0x151   :  { %472 = vmatprep.mubr.f32.mxu1 %v299_v59 }
 0x152   :  { %v679_v57 = vpop.eup %678  ;;  %437 = vmatprep.mubr.f32.mxu0 %v285_v61  ;;  %473 = vmatmul.mubr.f32.gmra.mrb[10].mxu1 %v298_v60 }
 0x153   :  { %v681_v11 = vpop.eup %680  ;;  %438 = vmatmul.mubr.f32.gmra.mrb[12].mxu0 %v284_v58  ;;  %v301_v3 = vmul.f32 %v679_v57, %v1119_v36  ;;  %v300_v41 = vmul.f32 %v679_v57, %v1116_v21  ;;  %v1214_v21 = vld [vmem:[%s1246_s2] ss:$0 sm:$0xff]  ;;  %s708_s2 = smov [#allocation2]  }
 0x154   :  { %v287_v5 = vmul.f32 %v681_v11, %v1139_v8  ;;  %v286_v23 = vmul.f32 %v681_v11, %v1136_v62  ;;  %s509_s30 = sshll.u32 %s708_s2, 4  ;;  %s510_s30 = int_to_ptr.vmem [resolvable:$true] %s509_s30 }
 0x155   :  { %477 = vmatprep.mubr.f32.mxu1 %v301_v3  ;;  %s684_s4 = scalar_lea.vmem %s510_s30, 2048  ;;  %p689_p1 = scmp.lt.s32.totalorder %s510_s30, %s510_s30 }
 0x156   :  { %v683_v13 = vpop.eup %682  ;;  %442 = vmatprep.mubr.f32.mxu0 %v287_v5  ;;  %478 = vmatmul.mubr.f32.gmra.mrb[12].mxu1 %v300_v41  ;;  %p685_p0 = scmp.ne.s32.totalorder %s510_s30, %s684_s4  ;;  %p690_p2 = scmp.lt.s32.totalorder %s684_s4, %s684_s4 }
 0x157   :  { %443 = vmatmul.mubr.f32.gmra.mrb[14].mxu0 %v286_v23  ;;  %v303_v52 = vmul.f32 %v683_v13, %v1151_v42  ;;  %v302_v18 = vmul.f32 %v683_v13, %v1148_v12 }
 0x158   :  { %p691_p3 = por %p690_p2, %p689_p1 }
 0x159   :  { %482 = vmatprep.mubr.f32.mxu1 %v303_v52 }
 0x15a   :  { %483 = vmatmul.mubr.f32.gmra.mrb[14].mxu1 %v302_v18  ;;  %p692_p4 = pnand %p691_p3, %p685_p0 }
 0x20d   :  { %v553_v40 = vpop.f32.mrb[0].mxu0 }
 0x20e   :  { %v554_v36 = vpop.f32.mrb[1].mxu0 }
 0x20f   :  { %v555_v8 = vadd.f32 %v554_v36, %v553_v40 }
 0x211   :  { %v410_v62 = vadd.f32 %v555_v8, %v1214_v21  ;;  %v577_v24 = vpop.f32.mrb[0].mxu1 }
 0x212   :  { %v556_v38 = vpop.f32.mrb[2].mxu0  ;;  %v578_v39 = vpop.f32.mrb[1].mxu1 }
 0x213   :  { %488 = vst [vmem:[#allocation2] sm:$0xff] %v410_v62  ;;  %v557_v25 = vpop.f32.mrb[3].mxu0  ;;  %v579_v42 = vadd.f32 %v578_v39, %v577_v24 }
 0x214   :  { %v558_v6 = vadd.f32 %v557_v25, %v556_v38 }
 0x215   :  { %v450_v12 = vadd.f32 %v579_v42, %v1214_v21  ;;  %v580_v26 = vpop.f32.mrb[2].mxu1 }
 0x216   :  { %v415_v4 = vadd.f32 %v558_v6, %v1214_v21  ;;  %v559_v53 = vpop.f32.mrb[4].mxu0  ;;  %v581_v27 = vpop.f32.mrb[3].mxu1 }
 0x217   :  { %496 = vst [vmem:[#allocation2 + $0x40] sm:$0xff] %v450_v12  ;;  %v560_v16 = vpop.f32.mrb[5].mxu0  ;;  %v582_v47 = vadd.f32 %v581_v27, %v580_v26 }
 0x218   :  { %489 = vst [vmem:[#allocation2 + $0x8] sm:$0xff] %v415_v4  ;;  %v561_v17 = vadd.f32 %v560_v16, %v559_v53 }
 0x219   :  { %v455_v46 = vadd.f32 %v582_v47, %v1214_v21  ;;  %v583_v22 = vpop.f32.mrb[4].mxu1 }
 0x21a   :  { %v420_v30 = vadd.f32 %v561_v17, %v1214_v21  ;;  %v562_v43 = vpop.f32.mrb[6].mxu0  ;;  %v584_v14 = vpop.f32.mrb[5].mxu1 }
 0x21b   :  { %497 = vst [vmem:[#allocation2 + $0x48] sm:$0xff] %v455_v46  ;;  %v563_v31 = vpop.f32.mrb[7].mxu0  ;;  %v585_v56 = vadd.f32 %v584_v14, %v583_v22 }
 0x21c   :  { %490 = vst [vmem:[#allocation2 + $0x10] sm:$0xff] %v420_v30  ;;  %v564_v55 = vadd.f32 %v563_v31, %v562_v43 }
 0x21d   :  { %v460_v15 = vadd.f32 %v585_v56, %v1214_v21  ;;  %v586_v44 = vpop.f32.mrb[6].mxu1 }
 0x21e   :  { %v425_v63 = vadd.f32 %v564_v55, %v1214_v21  ;;  %v565_v45 = vpop.f32.mrb[8].mxu0  ;;  %v587_v9 = vpop.f32.mrb[7].mxu1 }
 0x21f   :  { %498 = vst [vmem:[#allocation2 + $0x50] sm:$0xff] %v460_v15  ;;  %v566_v34 = vpop.f32.mrb[9].mxu0  ;;  %v588_v49 = vadd.f32 %v587_v9, %v586_v44 }
 0x220   :  { %491 = vst [vmem:[#allocation2 + $0x18] sm:$0xff] %v425_v63  ;;  %v567_v50 = vadd.f32 %v566_v34, %v565_v45 }
 0x221   :  { %v465_v51 = vadd.f32 %v588_v49, %v1214_v21  ;;  %v589_v32 = vpop.f32.mrb[8].mxu1 }
 0x222   :  { %v430_v10 = vadd.f32 %v567_v50, %v1214_v21  ;;  %v568_v7 = vpop.f32.mrb[10].mxu0  ;;  %v590_v33 = vpop.f32.mrb[9].mxu1 }
 0x223   :  { %499 = vst [vmem:[#allocation2 + $0x58] sm:$0xff] %v465_v51  ;;  %v569_v29 = vpop.f32.mrb[11].mxu0  ;;  %v591_v19 = vadd.f32 %v590_v33, %v589_v32 }
 0x224   :  { %492 = vst [vmem:[#allocation2 + $0x20] sm:$0xff] %v430_v10  ;;  %v570_v28 = vadd.f32 %v569_v29, %v568_v7 }
 0x225   :  { %v470_v0 = vadd.f32 %v591_v19, %v1214_v21  ;;  %v592_v20 = vpop.f32.mrb[10].mxu1 }
 0x226   :  { %v435_v54 = vadd.f32 %v570_v28, %v1214_v21  ;;  %v571_v48 = vpop.f32.mrb[12].mxu0  ;;  %v593_v35 = vpop.f32.mrb[11].mxu1 }
 0x227   :  { %500 = vst [vmem:[#allocation2 + $0x60] sm:$0xff] %v470_v0  ;;  %v572_v37 = vpop.f32.mrb[13].mxu0  ;;  %v594_v2 = vadd.f32 %v593_v35, %v592_v20 }
 0x228   :  { %493 = vst [vmem:[#allocation2 + $0x28] sm:$0xff] %v435_v54  ;;  %v573_v1 = vadd.f32 %v572_v37, %v571_v48 }
 0x229   :  { %v475_v59 = vadd.f32 %v594_v2, %v1214_v21  ;;  %v595_v60 = vpop.f32.mrb[12].mxu1 }
 0x22a   :  { %v440_v61 = vadd.f32 %v573_v1, %v1214_v21  ;;  %v574_v58 = vpop.f32.mrb[14].mxu0  ;;  %v596_v57 = vpop.f32.mrb[13].mxu1 }
 0x22b   :  { %501 = vst [vmem:[#allocation2 + $0x68] sm:$0xff] %v475_v59  ;;  %v575_v11 = vpop.f32.mrb[15].mxu0  ;;  %v597_v3 = vadd.f32 %v596_v57, %v595_v60 }
 0x22c   :  { %494 = vst [vmem:[#allocation2 + $0x30] sm:$0xff] %v440_v61  ;;  %v576_v41 = vadd.f32 %v575_v11, %v574_v58 }
 0x22d   :  { %v480_v5 = vadd.f32 %v597_v3, %v1214_v21  ;;  %v598_v23 = vpop.f32.mrb[14].mxu1 }
 0x22e   :  { %v445_v13 = vadd.f32 %v576_v41, %v1214_v21  ;;  %v599_v52 = vpop.f32.mrb[15].mxu1 }
 0x22f   :  { %502 = vst [vmem:[#allocation2 + $0x70] sm:$0xff] %v480_v5  ;;  %v600_v18 = vadd.f32 %v599_v52, %v598_v23 }
 0x230   :  { %495 = vst [vmem:[#allocation2 + $0x38] sm:$0xff] %v445_v13 }
 0x231   :  { %v485_v40 = vadd.f32 %v600_v18, %v1214_v21 }
 0x233   :  { %503 = vst [vmem:[#allocation2 + $0x78] sm:$0xff] %v485_v40 }
 0x234   :  { %695 = shalt.err (!%p692_p4)
}
 0x235   :  { %s696_s7 = scalar_lea.hbm %s1247_s3, 2048 }
 0x236   :  { %p697_p5 = scmp.ne.s32.totalorder %s1247_s3, %s696_s7  ;;  %p700_p6 = scmp.lt.u32.totalorder %s696_s7, %s1247_s3 }
 0x238   :  { %p702_p7 = pnand %p700_p6, %p697_p5 }
 0x23a   :  { %705 = shalt.err (!%p702_p7)
}
 0x23b   :  { %s709_s12 = smov 128   ;;  %s710_s13 = smov 8  }
 0x23c   :  { %515 = dma.vmem_to_hbm [thread:$0]  %s510_s30, 2048, %s1247_s3, [#allocation3], %s709_s12, %s709_s12, %s710_s13  }
 0x23d   :  { %706 = dma.done.wait [#allocation3], 2048  }
 0x23e   :  { %707 = vsyncadd [#allocation3], 4294965248 }
 0x23f   :  { %519 = vsyncpa [#allocation3], 1 }

</bundles_post_ra>
